<compile_context>
chip_gen: v7x
topology: tpu7x:2x2x1
jax: 0.10.0
libtpu: 0.0.40
codegen_flags: <defaults>
</compile_context>

<pallas_src>
import jax
import jax.numpy as jnp
from jax.experimental import pallas as pl
from jax.experimental.pallas import tpu as pltpu

# ---------------- problem sizes (small, consistent with the module) -----------
BATCH = 8          # number of samples
N_INPUT = 32       # n_input
N_HIDDEN = 128     # n_hidden (scvi default)
N_OUTPUT = 16      # n_output (latent dim)
LANE = 128         # TPU lane width; output slab / packed head width
VAR_EPS = 1e-4
BN_EPS = 1e-5


def encoder_kernel(
    x_ref,        # (B, N_INPUT)
    w1_ref,       # (N_INPUT, N_HIDDEN)   BN-folded W1^T
    w2_ref,       # (N_HIDDEN, LANE)      packed head weights [W2m | W2v | 0]
    b_ref,        # (2, LANE)             row 0: BN-folded b1, row 1: packed head bias
    eps_ref,      # (B, N_OUTPUT)         standard-normal noise for rsample
    out_ref,      # out: (B, LANE)        [qm(16) | qv(16) | z(16) | pad(80)]
):
    L = N_OUTPUT
    x = x_ref[...]

    # --- FCLayers (BN folded into W1/b1 offline): Linear -> ReLU ---
    h = jnp.dot(x, w1_ref[...], preferred_element_type=jnp.float32) + b_ref[0:1, :]
    h = jnp.maximum(h, 0.0)

    # --- dist_encoder: single fused 128-lane GEMM, then slice the two heads ---
    head = jnp.dot(h, w2_ref[...], preferred_element_type=jnp.float32) + b_ref[1:2, :]
    qm = head[:, :L]
    qv_raw = head[:, L:2 * L]

    # softplus(qv_raw) + var_eps  (numerically stable softplus)
    qv = jnp.maximum(qv_raw, 0.0) + jnp.log1p(jnp.exp(-jnp.abs(qv_raw))) + VAR_EPS

    # Normal(qm, sqrt(qv)).rsample(); z_transformation = identity ('normal')
    z = qm + jnp.sqrt(qv) * eps_ref[...]

    # One lane-dense full-width store: [qm | qv | z | zero pad]
    pad = jnp.zeros((x.shape[0], LANE - 3 * L), jnp.float32)
    out_ref[...] = jnp.concatenate([qm, qv, z, pad], axis=-1)


def prepare_params(raw):
    """One-time parameter transform (amortized over all calls).

    Folds eval-mode BatchNorm into W1/b1 and packs the dist_encoder weight/bias
    lane-dense so the kernel sees only 3 parameter arrays.
    """
    L = N_OUTPUT
    scale = raw["bn_gamma"] * jax.lax.rsqrt(raw["bn_rvar"] + BN_EPS)   # (1, N_HIDDEN)
    w1f = raw["w1_t"] * scale                                          # (N_INPUT, N_HIDDEN)
    b1f = (raw["b1"] - raw["bn_rmean"]) * scale + raw["bn_beta"]       # (1, N_HIDDEN)

    w2p = jnp.zeros((N_HIDDEN, LANE), jnp.float32)
    w2p = w2p.at[:, :L].set(raw["w2m_t"]).at[:, L:2 * L].set(raw["w2v_t"])

    b2p = jnp.zeros((LANE,), jnp.float32)
    b2p = b2p.at[:L].set(raw["b2m"][0]).at[L:2 * L].set(raw["b2v"][0])

    b_packed = jnp.zeros((2, LANE), jnp.float32)
    b_packed = b_packed.at[0].set(b1f[0]).at[1].set(b2p)

    return {"w1f": w1f, "w2p": w2p, "b_packed": b_packed}


def encoder_forward(x, packed, eps):
    """Run the Encoder forward pass in a single Pallas kernel (whole problem fits VMEM)."""
    B = x.shape[0]
    L = N_OUTPUT

    vmem_spec = pl.BlockSpec(memory_space=pltpu.MemorySpace.VMEM)
    inputs = (x, packed["w1f"], packed["w2p"], packed["b_packed"], eps)

    slab = pl.pallas_call(
        encoder_kernel,
        out_shape=jax.ShapeDtypeStruct((B, LANE), jnp.float32),
        in_specs=[vmem_spec] * len(inputs),
        out_specs=vmem_spec,
    )(*inputs)

    qm = slab[:, :L]
    qv = slab[:, L:2 * L]
    z = slab[:, 2 * L:3 * L]
    return qm, qv, z


def init_params(key):
    """Deterministic synthetic raw parameters matching the module's shapes."""
    ks = jax.random.split(key, 8)
    p = {}
    # FCLayers Linear(n_input -> n_hidden); PyTorch weight is (out, in); store transposed.
    p["w1_t"] = jax.random.normal(ks[0], (N_INPUT, N_HIDDEN), jnp.float32) * 0.05
    p["b1"] = jax.random.normal(ks[1], (1, N_HIDDEN), jnp.float32) * 0.01
    # BatchNorm1d(n_hidden) eval-mode stats/affine.
    p["bn_gamma"] = 1.0 + 0.1 * jax.random.normal(ks[2], (1, N_HIDDEN), jnp.float32)
    p["bn_beta"] = 0.1 * jax.random.normal(ks[3], (1, N_HIDDEN), jnp.float32)
    p["bn_rmean"] = 0.05 * jax.random.normal(ks[4], (1, N_HIDDEN), jnp.float32)
    p["bn_rvar"] = 1.0 + 0.1 * jnp.abs(jax.random.normal(ks[5], (1, N_HIDDEN), jnp.float32))
    # dist_encoder: Linear(n_hidden -> 2*n_output), split into mean / var heads.
    w2 = jax.random.normal(ks[6], (2 * N_OUTPUT, N_HIDDEN), jnp.float32) * 0.05
    b2 = jax.random.normal(ks[7], (1, 2 * N_OUTPUT), jnp.float32) * 0.01
    p["w2m_t"] = jnp.transpose(w2[:N_OUTPUT])   # (N_HIDDEN, N_OUTPUT)
    p["b2m"] = b2[:, :N_OUTPUT]
    p["w2v_t"] = jnp.transpose(w2[N_OUTPUT:])   # (N_HIDDEN, N_OUTPUT)
    p["b2v"] = b2[:, N_OUTPUT:]
    return p


def reference_forward(x, raw, eps):
    """Pure-JAX reference on the RAW (un-fused) parameters."""
    h = x @ raw["w1_t"] + raw["b1"]
    h = (h - raw["bn_rmean"]) * jax.lax.rsqrt(raw["bn_rvar"] + BN_EPS)
    h = h * raw["bn_gamma"] + raw["bn_beta"]
    h = jnp.maximum(h, 0.0)
    qm = h @ raw["w2m_t"] + raw["b2m"]
    qv = jax.nn.softplus(h @ raw["w2v_t"] + raw["b2v"]) + VAR_EPS
    z = qm + jnp.sqrt(qv) * eps
    return qm, qv, z


if __name__ == "__main__":
    key = jax.random.PRNGKey(0)
    k_param, k_x, k_eps = jax.random.split(key, 3)

    raw_params = init_params(k_param)
    packed_params = prepare_params(raw_params)   # one-time transform

    x = jax.random.normal(k_x, (BATCH, N_INPUT), jnp.float32)
    # reparameterization noise (rsample), generated outside the kernel for determinism
    eps = jax.random.normal(k_eps, (BATCH, N_OUTPUT), jnp.float32)

    qm, qv, z = encoder_forward(x, packed_params, eps)
    jax.block_until_ready((qm, qv, z))

    qm_ref, qv_ref, z_ref = reference_forward(x, raw_params, eps)
    assert jnp.allclose(qm, qm_ref, atol=1e-5, rtol=1e-4)
    assert jnp.allclose(qv, qv_ref, atol=1e-5, rtol=1e-4)
    assert jnp.allclose(z, z_ref, atol=1e-5, rtol=1e-4)

    print("KERNEL_OK")
</pallas_src>

<mosaic_0001>
module attributes {stable_mosaic.version = 11 : i64} {
  func.func @encoder_kernel(%arg0: memref<8x32xf32, #tpu.memory_space<vmem>>, %arg1: memref<32x128xf32, #tpu.memory_space<vmem>>, %arg2: memref<128x128xf32, #tpu.memory_space<vmem>>, %arg3: memref<2x128xf32, #tpu.memory_space<vmem>>, %arg4: memref<8x16xf32, #tpu.memory_space<vmem>>, %arg5: memref<8x128xf32, #tpu.memory_space<vmem>>) attributes {dimension_semantics = [], scalar_prefetch = 0 : i64, scratch_operands = 0 : i64, tpu.core_type = #tpu.core_type<tc>} {
    %c0 = arith.constant 0 : index
    %c0_0 = arith.constant 0 : index
    %0 = vector.load %arg0[%c0, %c0_0] : memref<8x32xf32, #tpu.memory_space<vmem>>, vector<8x32xf32>
    %c0_1 = arith.constant 0 : index
    %c0_2 = arith.constant 0 : index
    %1 = vector.load %arg1[%c0_1, %c0_2] : memref<32x128xf32, #tpu.memory_space<vmem>>, vector<32x128xf32>
    %cst = arith.constant dense<0.000000e+00> : vector<8x128xf32>
    %2 = tpu.matmul %0, %1, %cst {dimension_numbers = #tpu.dot_dimension_numbers<[1], [0], [0], [1], [0, 0, 1, 1], [], []>} : vector<8x32xf32>, vector<32x128xf32>, vector<8x128xf32> -> vector<8x128xf32>
    %c0_3 = arith.constant 0 : index
    %c0_4 = arith.constant 0 : index
    %3 = vector.load %arg3[%c0_3, %c0_4] : memref<2x128xf32, #tpu.memory_space<vmem>>, vector<1x128xf32>
    %4 = vector.broadcast %3 : vector<1x128xf32> to vector<8x128xf32>
    %5 = arith.addf %2, %4 : vector<8x128xf32>
    %cst_5 = arith.constant 0.000000e+00 : f32
    %6 = vector.broadcast %cst_5 : f32 to vector<8x128xf32>
    %7 = arith.maximumf %5, %6 : vector<8x128xf32>
    %c0_6 = arith.constant 0 : index
    %c0_7 = arith.constant 0 : index
    %8 = vector.load %arg2[%c0_6, %c0_7] : memref<128x128xf32, #tpu.memory_space<vmem>>, vector<128x128xf32>
    %cst_8 = arith.constant dense<0.000000e+00> : vector<8x128xf32>
    %9 = tpu.matmul %7, %8, %cst_8 {dimension_numbers = #tpu.dot_dimension_numbers<[1], [0], [0], [1], [0, 0, 1, 1], [], []>} : vector<8x128xf32>, vector<128x128xf32>, vector<8x128xf32> -> vector<8x128xf32>
    %c1 = arith.constant 1 : index
    %c0_9 = arith.constant 0 : index
    %10 = vector.load %arg3[%c1, %c0_9] : memref<2x128xf32, #tpu.memory_space<vmem>>, vector<1x128xf32>
    %11 = vector.broadcast %10 : vector<1x128xf32> to vector<8x128xf32>
    %12 = arith.addf %9, %11 : vector<8x128xf32>
    %13 = vector.extract_strided_slice %12 {offsets = [0, 0], sizes = [8, 16], strides = [1, 1]} : vector<8x128xf32> to vector<8x16xf32>
    %14 = vector.extract_strided_slice %12 {offsets = [0, 16], sizes = [8, 16], strides = [1, 1]} : vector<8x128xf32> to vector<8x16xf32>
    %cst_10 = arith.constant 0.000000e+00 : f32
    %15 = vector.broadcast %cst_10 : f32 to vector<8x16xf32>
    %16 = arith.maximumf %14, %15 : vector<8x16xf32>
    %17 = math.absf %14 : vector<8x16xf32>
    %cst_11 = arith.constant 0.000000e+00 : f32
    %18 = vector.broadcast %cst_11 : f32 to vector<8x16xf32>
    %19 = arith.subf %18, %17 : vector<8x16xf32>
    %20 = math.exp %19 : vector<8x16xf32>
    %21 = math.log1p %20 : vector<8x16xf32>
    %22 = arith.addf %16, %21 : vector<8x16xf32>
    %cst_12 = arith.constant 9.99999974E-5 : f32
    %23 = vector.broadcast %cst_12 : f32 to vector<8x16xf32>
    %24 = arith.addf %22, %23 : vector<8x16xf32>
    %25 = math.sqrt %24 : vector<8x16xf32>
    %c0_13 = arith.constant 0 : index
    %c0_14 = arith.constant 0 : index
    %26 = vector.load %arg4[%c0_13, %c0_14] : memref<8x16xf32, #tpu.memory_space<vmem>>, vector<8x16xf32>
    %27 = arith.mulf %25, %26 : vector<8x16xf32>
    %28 = arith.addf %13, %27 : vector<8x16xf32>
    %cst_15 = arith.constant 0.000000e+00 : f32
    %29 = vector.broadcast %cst_15 : f32 to vector<8x80xf32>
    %30 = tpu.concatenate %13, %24, %28, %29 in 1 : vector<8x16xf32>, vector<8x16xf32>, vector<8x16xf32>, vector<8x80xf32> -> vector<8x128xf32>
    %c0_16 = arith.constant 0 : index
    %c0_17 = arith.constant 0 : index
    %31 = vector.load %arg5[%c0_16, %c0_17] : memref<8x128xf32, #tpu.memory_space<vmem>>, vector<8x128xf32>
    tpu.vector_store %arg5[%c0_16, %c0_17], %30 {strides = array<i32>} : memref<8x128xf32, #tpu.memory_space<vmem>>, vector<8x128xf32>,
    return
  }
}

</mosaic_0001>

<bundles_post_ra>
// kernel: tpu_custom_call.1
= control target key start
LH: loop header
LB: loop body
LE: loop exit
PB: predicated region body
PF: predicated region fallthrough
CT: control target
= control target key end

     0   :  { %10 = vsyncpa [#allocation3], 0  ;;  %s616_s0 = inlined_call_operand.hbm [shape: f32[8,32], index: 0, kind: input, shape index: {}]   ;;  %s617_s1 = inlined_call_operand.hbm [shape: f32[32,128], index: 1, kind: input, shape index: {}]   ;;  %s618_s2 = inlined_call_operand.hbm [shape: f32[128,128], index: 2, kind: input, shape index: {}]   ;;  %s619_s3 = inlined_call_operand.vmem [shape: f32[2,128], index: 3, kind: input, shape index: {}]   ;;  %s620_s4 = inlined_call_operand.vmem [shape: f32[8,16], index: 4, kind: input, shape index: {}]   ;;  %s621_s5 = inlined_call_operand.hbm [shape: f32[8,128], index: 5, kind: output, shape index: {}]  }
   0x1   :  { %11 = vsyncpa [#allocation6], 0 }
   0x2   :  { %12 = vsyncpa [#allocation4], 0  ;;  %s509_s18 = smov [#allocation5]   ;;  %s415_s22 = scalar_lea.hbm %s617_s1, 512 }
   0x3   :  { %s28_s19 = sshll.u32 %s509_s18, 4  ;;  %p416_p0 = scmp.ne.s32.totalorder %s617_s1, %s415_s22  ;;  %s29_s19 = int_to_ptr.vmem [resolvable:$true] %s28_s19 }
   0x4   :  { %p419_p1 = scmp.lt.u32.totalorder %s415_s22, %s617_s1 }
   0x6   :  { %p421_p2 = pnand %p419_p1, %p416_p0 }
   0x8   :  { %424 = shalt.err (!%p421_p2)
}
   0x9   :  { %s425_s27 = scalar_lea.vmem %s29_s19, 512  ;;  %p430_p4 = scmp.lt.s32.totalorder %s29_s19, %s29_s19 }
   0xa   :  { %p426_p3 = scmp.ne.s32.totalorder %s29_s19, %s425_s27  ;;  %p431_p5 = scmp.lt.s32.totalorder %s425_s27, %s425_s27 }
   0xc   :  { %p432_p6 = por %p431_p5, %p430_p4 }
   0xe   :  { %p433_p7 = pnand %p432_p6, %p426_p3 }
  0x10   :  { %436 = shalt.err (!%p433_p7)
}
  0x11   :  { %s510_s28 = smov 128   ;;  %s511_s29 = smov 8  }
  0x12   :  { %34 = dma.hbm_to_vmem [thread:$0]  %s617_s1, 512, %s29_s19, [#allocation6], %s510_s28, %s510_s28, %s511_s29  }
  0x13   :  { %s512_s7 = smov [#allocation2]   ;;  %s513_s9 = smov [#allocation7]  }
  0x14   :  { %s19_s8 = sshll.u32 %s512_s7, 4  ;;  %s40_s10 = sshll.u32 %s513_s9, 4  ;;  %s20_s8 = int_to_ptr.vmem [resolvable:$true] %s19_s8  ;;  %s41_s10 = int_to_ptr.vmem [resolvable:$true] %s40_s10 }
  0x15   :  { %s437_s13 = scalar_lea.hbm %s616_s0, 128 }
  0x16   :  { %p438_p8 = scmp.ne.s32.totalorder %s616_s0, %s437_s13  ;;  %p441_p9 = scmp.lt.u32.totalorder %s437_s13, %s616_s0 }
  0x18   :  { %p443_p10 = pnand %p441_p9, %p438_p8 }
  0x1a   :  { %446 = shalt.err (!%p443_p10)
}
  0x1b   :  { %s447_s1 = scalar_lea.vmem %s20_s8, 128  ;;  %p452_p12 = scmp.lt.s32.totalorder %s20_s8, %s20_s8 }
  0x1c   :  { %p448_p11 = scmp.ne.s32.totalorder %s20_s8, %s447_s1  ;;  %p453_p13 = scmp.lt.s32.totalorder %s447_s1, %s447_s1 }
  0x1e   :  { %p454_p0 = por %p453_p13, %p452_p12 }
  0x20   :  { %p455_p1 = pnand %p454_p0, %p448_p11 }
  0x22   :  { %458 = shalt.err (!%p455_p1)
}
  0x23   :  { %22 = dma.hbm_to_vmem [thread:$0]  %s616_s0, 128, %s20_s8, [#allocation3]  }
  0x24   :  { %s459_s22 = scalar_lea.hbm %s618_s2, 2048 }
  0x25   :  { %p460_p2 = scmp.ne.s32.totalorder %s618_s2, %s459_s22  ;;  %p463_p3 = scmp.lt.u32.totalorder %s459_s22, %s618_s2 }
  0x27   :  { %p465_p4 = pnand %p463_p3, %p460_p2 }
  0x29   :  { %468 = shalt.err (!%p465_p4)
}
  0x2a   :  { %s469_s27 = scalar_lea.vmem %s41_s10, 2048  ;;  %p474_p6 = scmp.lt.s32.totalorder %s41_s10, %s41_s10 }
  0x2b   :  { %p470_p5 = scmp.ne.s32.totalorder %s41_s10, %s469_s27  ;;  %p475_p7 = scmp.lt.s32.totalorder %s469_s27, %s469_s27 }
  0x2d   :  { %p476_p8 = por %p475_p7, %p474_p6 }
  0x2f   :  { %p477_p9 = pnand %p476_p8, %p470_p5 }
  0x31   :  { %480 = shalt.err (!%p477_p9)
}
  0x32   :  { %46 = dma.hbm_to_vmem [thread:$0]  %s618_s2, 2048, %s41_s10, [#allocation6], %s510_s28, %s510_s28, %s511_s29  }
  0x33   :  { %503 = dma.done.wait [#allocation3], 128  }
  0x34   :  { %504 = vsyncadd [#allocation3], 4294967168 }
  0x35   :  { %505 = dma.done.wait [#allocation6], 2560  }
  0x36   :  { %506 = vsyncadd [#allocation6], 4294964736  ;;  %v514_v0 = vmov 0.0|0.0   ;;  %vm515_vm0 = vmmov 0   ;;  %v516_v1 = vmov 0.0   ;;  %v61_v2 = vld [vmem:[#allocation5] sm:$0xff] }
  0x37   :  { %367 = vmatprep.subr.bf16.mxu0 %v514_v0  ;;  %329 = vmatprep.mubr.msk.f32.mxu0 %vm515_vm0, %v516_v1  ;;  %v62_v3 = vld [vmem:[#allocation5 + $0x8] sm:$0xff]  ;;  %v63_v4 = vld [vmem:[#allocation5 + $0x10] sm:$0xff]  ;;  %v64_v6 = vld [vmem:[#allocation5 + $0x18] sm:$0xff]  ;;  %vm70_vm1 = vcmask 261120   ;;  %s517_s29 = smov 16   ;;  %vm274_vm5 = vcmask 130048  }
  0x38   :  { %373 = vmatprep.subr.bf16.mxu1 %v514_v0  ;;  %364 = vmatprep.mubr.msk.f32.mxu1 %vm515_vm0, %v516_v1  ;;  %v368_v5 = vpack.c.bf16 %v62_v3, %v61_v2  ;;  %v145_v7 = vld [vmem:[#allocation7] sm:$0xff]  ;;  %v146_v8 = vld [vmem:[#allocation7 + $0x8] sm:$0xff]  ;;  %v147_v9 = vld [vmem:[#allocation7 + $0x10] sm:$0xff]  ;;  %v371_v11 = vpack.c.bf16 %v64_v6, %v63_v4  ;;  %s520_s10 = smov [#allocation8]   ;;  %vm277_vm6 = vcmask 392192  }
  0x39   :  { %v148_v10 = vld [vmem:[#allocation7 + $0x18] sm:$0xff]  ;;  %v374_v12 = vpack.c.bf16 %v146_v8, %v145_v7  ;;  %v149_v14 = vld [vmem:[#allocation7 + $0x20] sm:$0xff]  ;;  %v150_v15 = vld [vmem:[#allocation7 + $0x28] sm:$0xff]  ;;  %s286_s11 = sshll.u32 %s520_s10, 4  ;;  %s287_s11 = int_to_ptr.vmem [resolvable:$true] %s286_s11 }
  0x3a   :  { %369 = vmatpush3.bf16.msra.mxu0 %v368_v5  ;;  %v377_v13 = vpack.c.bf16 %v148_v10, %v147_v9  ;;  %v60_v16 = vld [vmem:[#allocation2] sm:$0xff]  ;;  %v380_v17 = vpack.c.bf16 %v150_v15, %v149_v14  ;;  %v151_v18 = vld [vmem:[#allocation7 + $0x30] sm:$0xff]  ;;  %v153_v21 = vld [vmem:[#allocation7 + $0x40] sm:$0xff]  ;;  %s481_s12 = scalar_lea.vmem %s287_s11, 128  ;;  %p486_p11 = scmp.lt.s32.totalorder %s287_s11, %s287_s11 }
  0x3b   :  { %370 = vmatprep.subr.bf16.mxu0 %v514_v0  ;;  %375 = vmatpush3.bf16.msra.mxu1 %v374_v12  ;;  %v152_v19 = vld [vmem:[#allocation7 + $0x38] sm:$0xff]  ;;  %v154_v22 = vld [vmem:[#allocation7 + $0x48] sm:$0xff]  ;;  %v155_v24 = vld [vmem:[#allocation7 + $0x50] sm:$0xff]  ;;  %p482_p10 = scmp.ne.s32.totalorder %s287_s11, %s481_s12  ;;  %p487_p12 = scmp.lt.s32.totalorder %s481_s12, %s481_s12 }
  0x3c   :  { %376 = vmatprep.subr.bf16.mxu1 %v514_v0  ;;  %v383_v20 = vpack.c.bf16 %v152_v19, %v151_v18  ;;  %v386_v23 = vpack.c.bf16 %v154_v22, %v153_v21  ;;  %v156_v25 = vld [vmem:[#allocation7 + $0x58] sm:$0xff]  ;;  %v157_v27 = vld [vmem:[#allocation7 + $0x60] sm:$0xff]  ;;  %v158_v28 = vld [vmem:[#allocation7 + $0x68] sm:$0xff] }
  0x3d   :  { %v389_v26 = vpack.c.bf16 %v156_v25, %v155_v24  ;;  %v392_v29 = vpack.c.bf16 %v158_v28, %v157_v27  ;;  %v159_v30 = vld [vmem:[#allocation7 + $0x70] sm:$0xff]  ;;  %v160_v31 = vld [vmem:[#allocation7 + $0x78] sm:$0xff]  ;;  %p488_p13 = por %p487_p12, %p486_p11 }
  0x3e   :  { %372 = vmatpush3.bf16.msra.mxu0 %v371_v11  ;;  %v395_v32 = vpack.c.bf16 %v160_v31, %v159_v30  ;;  %v259_v33 = vld [vmem:[%s620_s4] sm:$0xff]  ;;  %s519_s4 = smov 32  }
  0x3f   :  { %378 = vmatpush3.bf16.msra.mxu1 %v377_v13  ;;  %261 = vrot.lane.b32.xlu0 %v259_v33, %s517_s29  ;;  %v296_v34 = vld [vmem:[%s619_s3] ss:$0 sm:$0xff]  ;;  %v298_v39 = vld [vmem:[%s619_s3 + $0x1] ss:$0 sm:$0xff]  ;;  %s518_s3 = smov 112   ;;  %p489_p0 = pnand %p488_p13, %p482_p10 }
  0x40   :  { %379 = vmatprep.subr.bf16.mxu1 %v514_v0 }
  0x41   :  { %330 = vmatmul.mubr.msk.f32.vlgmr.msra.gmra.mrb[0].mxu0 %vm70_vm1, %v60_v16 }
  0x43   :  { %381 = vmatpush3.bf16.msra.mxu1 %v380_v17 }
  0x44   :  { %382 = vmatprep.subr.bf16.mxu1 %v514_v0 }
  0x47   :  { %384 = vmatpush3.bf16.msra.mxu1 %v383_v20 }
  0x48   :  { %385 = vmatprep.subr.bf16.mxu1 %v514_v0 }
  0x4b   :  { %387 = vmatpush3.bf16.msra.mxu1 %v386_v23 }
  0x4c   :  { %388 = vmatprep.subr.bf16.mxu1 %v514_v0 }
  0x4f   :  { %390 = vmatpush3.bf16.msra.mxu1 %v389_v26 }
  0x50   :  { %391 = vmatprep.subr.bf16.mxu1 %v514_v0 }
  0x53   :  { %393 = vmatpush3.bf16.msra.mxu1 %v392_v29 }
  0x54   :  { %394 = vmatprep.subr.bf16.mxu1 %v514_v0 }
  0x57   :  { %396 = vmatpush3.bf16.msra.mxu1 %v395_v32 }
  0xb1   :  { %v262_v60 = vpop.permute.xlu0 %261 }
 0x114   :  { %v140_v35 = vpop.f32.mrb[0].mxu0 }
 0x115   :  { %v141_v36 = vadd.f32 %v296_v34, %v140_v35  ;;  %v331_v37 = vpop.f32.mrb[1].mxu0 }
 0x117   :  { %v144_v38 = vmax.f32 %v141_v36, 0.0 }
 0x119   :  { %365 = vmatmul.mubr.f32.vlgmr.msra.gmra.mrb[0].mxu1 %v144_v38 }
 0x1ec   :  { %v232_v40 = vpop.f32.mrb[0].mxu1 }
 0x1ed   :  { %v233_v41 = vadd.f32 %v298_v39, %v232_v40  ;;  %v366_v42 = vpop.f32.mrb[1].mxu1 }
 0x1ef   :  { %v237_v43 = vand.u32 2147483647, %v233_v41  ;;  %v236_v54 = vmax.f32 %v233_v41, 0.0 }
 0x1f1   :  { %v238_v44 = vsub.f32 0.0, %v237_v43 }
 0x1f3   :  { %v239_v45 = vmul.f32 1.442695, %v238_v44 }
 0x1f5   :  { %409 = vpow2.f32 %v239_v45 }
 0x1ff   :  { %v410_v46 = vpop.eup %409 }
 0x200   :  { %v241_v47 = vadd.f32 1.0, %v410_v46  ;;  %v244_v48 = vmul.f32 -0.5, %v410_v46  ;;  %v247_v50 = vand.u32 2147483647, %v410_v46 }
 0x202   :  { %411 = vlog2.f32 %v241_v47  ;;  %v245_v49 = vadd.f32 1.0, %v244_v48  ;;  %vm248_vm2 = vcmp.lt.f32.partialorder %v247_v50, 0.0004427343 }
 0x204   :  { %v246_v53 = vmul.f32 %v410_v46, %v245_v49 }
 0x20c   :  { %v412_v51 = vpop.eup %411 }
 0x20d   :  { %v243_v52 = vmul.f32 0.6931472, %v412_v51 }
 0x20f   :  { %v249_v55 = vsel %vm248_vm2, %v246_v53, %v243_v52 }
 0x210   :  { %v250_v56 = vadd.f32 %v249_v55, %v236_v54 }
 0x212   :  { %v251_v57 = vadd.f32 0.0001, %v250_v56 }
 0x214   :  { %413 = vrsqrt.f32 %v251_v57  ;;  %vm254_vm3 = vcmp.eq.f32.partialorder %v251_v57, inf  ;;  %v257_v61 = vand.u32 2147483648, %v251_v57  ;;  %vm256_vm4 = vcmp.eq.f32.partialorder %v251_v57, 0.0 }
 0x215   :  { %v275_v3 = vsel %vm274_vm5, %v233_v41, %v251_v57 }
 0x21e   :  { %v414_v58 = vpop.eup %413 }
 0x21f   :  { %v253_v59 = vmul.f32 %v414_v58, %v251_v57 }
 0x221   :  { %v255_v62 = vsel %vm254_vm3, %v251_v57, %v253_v59 }
 0x222   :  { %v258_v63 = vsel %vm256_vm4, %v257_v61, %v255_v62 }
 0x223   :  { %v264_v0 = vmul.f32 %v262_v60, %v258_v63 }
 0x225   :  { %266 = vrot.lane.b32.xlu0 %v264_v0, %s518_s3 }
 0x297   :  { %v267_v1 = vpop.permute.xlu0 %266 }
 0x298   :  { %v269_v2 = vadd.f32 %v267_v1, %v233_v41 }
 0x29a   :  { %271 = vrot.lane.b32.xlu1 %v269_v2, %s519_s4 }
 0x30c   :  { %v272_v4 = vpop.permute.xlu1 %271 }
 0x30d   :  { %v276_v5 = vsel %vm70_vm1, %v275_v3, %v272_v4 }
 0x30e   :  { %v278_v6 = vsel %vm277_vm6, %v276_v5, 0.0 }
 0x30f   :  { %279 = vst [vmem:[#allocation8] sm:$0xff] %v278_v6 }
 0x310   :  { %492 = shalt.err (!%p489_p0)
}
 0x311   :  { %s493_s15 = scalar_lea.hbm %s621_s5, 128 }
 0x312   :  { %p494_p1 = scmp.ne.s32.totalorder %s621_s5, %s493_s15  ;;  %p497_p2 = scmp.lt.u32.totalorder %s493_s15, %s621_s5 }
 0x314   :  { %p499_p3 = pnand %p497_p2, %p494_p1 }
 0x316   :  { %502 = shalt.err (!%p499_p3)
}
 0x317   :  { %289 = dma.vmem_to_hbm [thread:$0]  %s287_s11, 128, %s621_s5, [#allocation4]  }
 0x318   :  { %507 = dma.done.wait [#allocation4], 128  }
 0x319   :  { %508 = vsyncadd [#allocation4], 4294967168 }
 0x31a   :  { %293 = vsyncpa [#allocation3], 1 }
 0x31b   :  { %294 = vsyncpa [#allocation6], 1 }
 0x31c   :  { %295 = vsyncpa [#allocation4], 1 }

</bundles_post_ra>
